<compile_context>
chip_gen: v6e
topology: v6e:2x2x1
jax: 0.10.0
libtpu: 0.0.40
codegen_flags: <defaults>
</compile_context>

<pallas_src>
import jax
import jax.numpy as jnp
from jax.experimental import pallas as pl
from jax.experimental.pallas import tpu as pltpu

# Model configuration (small, consistent with the module's __init__)
NUM_INPUTS = 16                        # numberOfInputs
STRUCTURE = (32, 32)                   # hidden layer sizes of FeedForwardDNN
NUM_ATOMS = 51                         # numberOfAtoms (C51 default)
NUM_ACTIONS = 2                        # numberOfActions
NUM_OUTPUTS = NUM_ACTIONS * NUM_ATOMS  # numberOfOutputs = 102
LEAKY_SLOPE = 0.01                     # torch.nn.LeakyReLU default

# Packed output block: both actions' atoms live in a single 128-lane block.
OUT_PAD = 128                          # lanes 0..101 real, 102..127 padded
NEG_PAD = -1e9                         # padded-lane bias -> exp underflows to 0
TB_CAP = 4096                          # max rows per batch tile (VMEM-safe)


def _round_up(n, m):
    return ((n + m - 1) // m) * m


def _cdiv(a, b):
    return -(-a // b)


def _leaky_relu(x):
    return jnp.where(x > 0, x, LEAKY_SLOPE * x)


def _choose_tiling(batch):
    """Pick (tile_rows, n_grid_steps).

    - batch <= 8: single 8-row tile.
    - otherwise: an even number of steps (>=2 so v7x's two TensorCores can
      split the 'parallel' batch axis), each tile <= TB_CAP rows, sized from
      the batch so padding stays under one sublane group per step.
    """
    b8 = _round_up(max(batch, 1), 8)
    if b8 <= 8:
        return 8, 1
    n_steps = max(2, _cdiv(b8, TB_CAP))
    if n_steps % 2:
        n_steps += 1
    tb = _round_up(_cdiv(b8, n_steps), 8)
    return tb, n_steps


def cdqn_kernel(x_ref, w1_ref, b1_ref, w2_ref, b2_ref, w3_ref, b3_ref, out_ref):
    """One batch tile: MLP + per-action softmax + clamp, entirely in VMEM.

    x_ref:   (TB, NUM_INPUTS) f32
    w*_ref:  (in, out) bf16 weights; b*_ref: (1, out) f32 biases.
             W3/b3 are packed+lane-padded to OUT_PAD=128; padded bias lanes
             hold -1e9 so their exp underflows to exactly 0 in f32.
    out_ref: (TB, OUT_PAD) lane-dense f32 output.
    """
    x = x_ref[...]  # f32

    # Hidden layer 1: Linear (bf16 MXU operands, f32 accumulate) + LeakyReLU (f32)
    h = jnp.dot(x.astype(jnp.bfloat16), w1_ref[...],
                preferred_element_type=jnp.float32) + b1_ref[...]
    h = _leaky_relu(h)

    # Hidden layer 2
    h = jnp.dot(h.astype(jnp.bfloat16), w2_ref[...],
                preferred_element_type=jnp.float32) + b2_ref[...]
    h = _leaky_relu(h)

    # Output layer: logits for both actions packed into one 128-lane block.
    z = jnp.dot(h.astype(jnp.bfloat16), w3_ref[...],
                preferred_element_type=jnp.float32) + b3_ref[...]   # (TB, 128)

    # Two per-action softmaxes over the packed block via lane masks.
    lane = jax.lax.broadcasted_iota(jnp.int32, z.shape, dimension=1)
    mask0 = lane < NUM_ATOMS                                        # action 0
    mask1 = jnp.logical_and(lane >= NUM_ATOMS, lane < 2 * NUM_ATOMS)  # action 1

    neg = jnp.float32(-1e30)
    m0 = jnp.max(jnp.where(mask0, z, neg), axis=-1, keepdims=True)
    m1 = jnp.max(jnp.where(mask1, z, neg), axis=-1, keepdims=True)
    m = jnp.where(mask0, m0, m1)          # padded lanes use m1 (harmless)

    e = jnp.exp(z - m)                    # padded lanes: exp(-1e9 - m1) -> 0.0
    s0 = jnp.sum(jnp.where(mask0, e, 0.0), axis=-1, keepdims=True)
    s1 = jnp.sum(jnp.where(mask1, e, 0.0), axis=-1, keepdims=True)
    inv = jnp.where(mask0,
                    pl.reciprocal(s0, approx=True),
                    pl.reciprocal(s1, approx=True))

    # Clamp; padded lanes become 1e-6 and are sliced off in the wrapper.
    out_ref[...] = jnp.maximum(e * inv, 1e-6).astype(out_ref.dtype)


def cdqn_forward(x, packed_params):
    """Batched forward pass. x: (B, NUM_INPUTS) -> (B, NUM_ACTIONS, NUM_ATOMS)."""
    w1, b1, w2, b2, w3p, b3p = packed_params
    batch = x.shape[0]

    tb, n_steps = _choose_tiling(batch)
    b_pad = tb * n_steps
    if b_pad != batch:
        x = jnp.pad(x, ((0, b_pad - batch), (0, 0)))

    h1, h2 = STRUCTURE
    flops = 2 * b_pad * (NUM_INPUTS * h1 + h1 * h2 + h2 * OUT_PAD)
    transcendentals = b_pad * (OUT_PAD + NUM_ACTIONS)   # exp + recip
    bytes_accessed = (4 * b_pad * (NUM_INPUTS + OUT_PAD)          # x in, out
                      + 2 * (NUM_INPUTS * h1 + h1 * h2 + h2 * OUT_PAD)  # bf16 W
                      + 4 * (h1 + h2 + OUT_PAD))                  # f32 biases

    out_padded = pl.pallas_call(
        cdqn_kernel,
        out_shape=jax.ShapeDtypeStruct((b_pad, OUT_PAD), jnp.float32),
        grid_spec=pltpu.PrefetchScalarGridSpec(
            num_scalar_prefetch=0,
            grid=(n_steps,),
            in_specs=[
                # x: tiled over batch
                pl.BlockSpec((tb, NUM_INPUTS), lambda i: (i, 0)),
                # weights / biases: full blocks, constant index -> VMEM-resident
                pl.BlockSpec((NUM_INPUTS, h1), lambda i: (0, 0)),
                pl.BlockSpec((1, h1), lambda i: (0, 0)),
                pl.BlockSpec((h1, h2), lambda i: (0, 0)),
                pl.BlockSpec((1, h2), lambda i: (0, 0)),
                pl.BlockSpec((h2, OUT_PAD), lambda i: (0, 0)),
                pl.BlockSpec((1, OUT_PAD), lambda i: (0, 0)),
            ],
            out_specs=pl.BlockSpec((tb, OUT_PAD), lambda i: (i, 0)),
        ),
        compiler_params=pltpu.CompilerParams(
            dimension_semantics=("parallel",)),   # 2x on v7x's dual TC
        cost_estimate=pl.CostEstimate(
            flops=flops, transcendentals=transcendentals,
            bytes_accessed=bytes_accessed),
    )(x, w1, b1, w2, b2, w3p, b3p)

    # Wrapper-side (free) slice/reshape back to the PyTorch output layout.
    out = out_padded[:batch, :NUM_OUTPUTS]
    return out.reshape(batch, NUM_ACTIONS, NUM_ATOMS)


def init_params(key):
    """Deterministic init mimicking torch.nn.Linear default:
    U(-1/sqrt(fan_in), 1/sqrt(fan_in)). Weights stored as (in, out), f32."""
    dims = (NUM_INPUTS,) + STRUCTURE + (NUM_OUTPUTS,)
    params = []
    for i in range(len(dims) - 1):
        fan_in, fan_out = dims[i], dims[i + 1]
        key, kw, kb = jax.random.split(key, 3)
        bound = 1.0 / jnp.sqrt(jnp.float32(fan_in))
        w = jax.random.uniform(kw, (fan_in, fan_out), jnp.float32, -bound, bound)
        b = jax.random.uniform(kb, (1, fan_out), jnp.float32, -bound, bound)
        params.extend([w, b])
    return tuple(params)


def pack_params(params):
    """Prepare kernel params: bf16 MXU weights; output layer lane-padded to
    OUT_PAD=128 columns (zero weight columns, -1e9 bias in padded lanes)."""
    w1, b1, w2, b2, w3, b3 = params
    pad = OUT_PAD - NUM_OUTPUTS
    w3p = jnp.pad(w3, ((0, 0), (0, pad)))                       # zero columns
    b3p = jnp.pad(b3, ((0, 0), (0, pad)), constant_values=NEG_PAD)
    return (w1.astype(jnp.bfloat16), b1,
            w2.astype(jnp.bfloat16), b2,
            w3p.astype(jnp.bfloat16), b3p)


def reference_forward(x, params):
    """Pure-JAX f32 reference for correctness checking (unpadded params)."""
    w1, b1, w2, b2, w3, b3 = params
    h = _leaky_relu(x @ w1 + b1)
    h = _leaky_relu(h @ w2 + b2)
    logits = h @ w3 + b3
    z = logits.reshape(-1, NUM_ACTIONS, NUM_ATOMS)
    p = jax.nn.softmax(z, axis=-1)
    return jnp.maximum(p, 1e-6)


if __name__ == "__main__":
    key = jax.random.PRNGKey(0)
    key, kx = jax.random.split(key)
    params = init_params(key)
    packed = pack_params(params)

    # Tolerances are loosened vs. the pure-f32 reference: bf16 MXU operands
    # (~0.4% relative per product) + approx EUP reciprocal (~1e-3 relative).
    ATOL, RTOL = 5e-3, 5e-2

    # Small-batch check (single 8-row tile, grid=(1,)).
    x_small = jax.random.normal(kx, (2, NUM_INPUTS), jnp.float32)
    out_small = jax.block_until_ready(cdqn_forward(x_small, packed))
    ref_small = reference_forward(x_small, params)
    assert out_small.shape == (2, NUM_ACTIONS, NUM_ATOMS)
    assert jnp.allclose(out_small, ref_small, atol=ATOL, rtol=RTOL), \
        "mismatch (small batch)"
    assert jnp.allclose(out_small.sum(-1), 1.0, atol=1e-2)

    # Larger batch exercises the 2-step parallel batch grid (one tile per TC
    # on v7x; two large back-to-back tiles on v5e/v6e).
    key, kx2 = jax.random.split(key)
    x_big = jax.random.normal(kx2, (512, NUM_INPUTS), jnp.float32)
    out_big = jax.block_until_ready(cdqn_forward(x_big, packed))
    ref_big = reference_forward(x_big, params)
    assert out_big.shape == (512, NUM_ACTIONS, NUM_ATOMS)
    assert jnp.allclose(out_big, ref_big, atol=ATOL, rtol=RTOL), \
        "mismatch (large batch)"
    assert jnp.allclose(out_big.sum(-1), 1.0, atol=1e-2)

    print("KERNEL_OK")
</pallas_src>

<mosaic_0001>
module attributes {stable_mosaic.version = 11 : i64} {
  func.func @cdqn_kernel(%arg0: i32, %arg1: memref<8x16xf32, #tpu.memory_space<vmem>>, %arg2: memref<16x32xbf16, #tpu.memory_space<vmem>>, %arg3: memref<1x32xf32, #tpu.memory_space<vmem>>, %arg4: memref<32x32xbf16, #tpu.memory_space<vmem>>, %arg5: memref<1x32xf32, #tpu.memory_space<vmem>>, %arg6: memref<32x128xbf16, #tpu.memory_space<vmem>>, %arg7: memref<1x128xf32, #tpu.memory_space<vmem>>, %arg8: memref<8x128xf32, #tpu.memory_space<vmem>>) attributes {dimension_semantics = [#tpu.dimension_semantics<parallel>], iteration_bounds = array<i64: 1>, scalar_prefetch = 0 : i64, scratch_operands = 0 : i64, tpu.core_type = #tpu.core_type<tc>, window_params = [{transform_indices = @transform_0, window_bounds = array<i64: 8, 16>}, {pipeline_mode = #tpu.pipeline_mode<synchronous>, transform_indices = @transform_1, window_bounds = array<i64: 16, 32>}, {pipeline_mode = #tpu.pipeline_mode<synchronous>, transform_indices = @transform_2, window_bounds = array<i64: 1, 32>}, {pipeline_mode = #tpu.pipeline_mode<synchronous>, transform_indices = @transform_3, window_bounds = array<i64: 32, 32>}, {pipeline_mode = #tpu.pipeline_mode<synchronous>, transform_indices = @transform_4, window_bounds = array<i64: 1, 32>}, {pipeline_mode = #tpu.pipeline_mode<synchronous>, transform_indices = @transform_5, window_bounds = array<i64: 32, 128>}, {pipeline_mode = #tpu.pipeline_mode<synchronous>, transform_indices = @transform_6, window_bounds = array<i64: 1, 128>}, {transform_indices = @transform_7, window_bounds = array<i64: 8, 128>}]} {
    %c0 = arith.constant 0 : index
    %c0_0 = arith.constant 0 : index
    %0 = vector.load %arg1[%c0, %c0_0] : memref<8x16xf32, #tpu.memory_space<vmem>>, vector<8x16xf32>
    %1 = arith.truncf %0 : vector<8x16xf32> to vector<8x16xbf16>
    %c0_1 = arith.constant 0 : index
    %c0_2 = arith.constant 0 : index
    %2 = vector.load %arg2[%c0_1, %c0_2] : memref<16x32xbf16, #tpu.memory_space<vmem>>, vector<16x32xbf16>
    %cst = arith.constant dense<0.000000e+00> : vector<8x32xf32>
    %3 = tpu.matmul %1, %2, %cst {dimension_numbers = #tpu.dot_dimension_numbers<[1], [0], [0], [1], [0, 0, 1, 1], [], []>} : vector<8x16xbf16>, vector<16x32xbf16>, vector<8x32xf32> -> vector<8x32xf32>
    %c0_3 = arith.constant 0 : index
    %c0_4 = arith.constant 0 : index
    %4 = vector.load %arg3[%c0_3, %c0_4] : memref<1x32xf32, #tpu.memory_space<vmem>>, vector<1x32xf32>
    %5 = vector.broadcast %4 : vector<1x32xf32> to vector<8x32xf32>
    %6 = arith.addf %3, %5 : vector<8x32xf32>
    %cst_5 = arith.constant 0.000000e+00 : f32
    %7 = vector.broadcast %cst_5 : f32 to vector<8x32xf32>
    %8 = arith.cmpf ogt, %6, %7 : vector<8x32xf32>
    %cst_6 = arith.constant 0.00999999977 : f32
    %9 = vector.broadcast %cst_6 : f32 to vector<8x32xf32>
    %10 = arith.mulf %9, %6 : vector<8x32xf32>
    %11 = arith.select %8, %6, %10 : vector<8x32xi1>, vector<8x32xf32>
    %12 = arith.truncf %11 : vector<8x32xf32> to vector<8x32xbf16>
    %c0_7 = arith.constant 0 : index
    %c0_8 = arith.constant 0 : index
    %13 = vector.load %arg4[%c0_7, %c0_8] : memref<32x32xbf16, #tpu.memory_space<vmem>>, vector<32x32xbf16>
    %cst_9 = arith.constant dense<0.000000e+00> : vector<8x32xf32>
    %14 = tpu.matmul %12, %13, %cst_9 {dimension_numbers = #tpu.dot_dimension_numbers<[1], [0], [0], [1], [0, 0, 1, 1], [], []>} : vector<8x32xbf16>, vector<32x32xbf16>, vector<8x32xf32> -> vector<8x32xf32>
    %c0_10 = arith.constant 0 : index
    %c0_11 = arith.constant 0 : index
    %15 = vector.load %arg5[%c0_10, %c0_11] : memref<1x32xf32, #tpu.memory_space<vmem>>, vector<1x32xf32>
    %16 = vector.broadcast %15 : vector<1x32xf32> to vector<8x32xf32>
    %17 = arith.addf %14, %16 : vector<8x32xf32>
    %cst_12 = arith.constant 0.000000e+00 : f32
    %18 = vector.broadcast %cst_12 : f32 to vector<8x32xf32>
    %19 = arith.cmpf ogt, %17, %18 : vector<8x32xf32>
    %cst_13 = arith.constant 0.00999999977 : f32
    %20 = vector.broadcast %cst_13 : f32 to vector<8x32xf32>
    %21 = arith.mulf %20, %17 : vector<8x32xf32>
    %22 = arith.select %19, %17, %21 : vector<8x32xi1>, vector<8x32xf32>
    %23 = arith.truncf %22 : vector<8x32xf32> to vector<8x32xbf16>
    %c0_14 = arith.constant 0 : index
    %c0_15 = arith.constant 0 : index
    %24 = vector.load %arg6[%c0_14, %c0_15] : memref<32x128xbf16, #tpu.memory_space<vmem>>, vector<32x128xbf16>
    %cst_16 = arith.constant dense<0.000000e+00> : vector<8x128xf32>
    %25 = tpu.matmul %23, %24, %cst_16 {dimension_numbers = #tpu.dot_dimension_numbers<[1], [0], [0], [1], [0, 0, 1, 1], [], []>} : vector<8x32xbf16>, vector<32x128xbf16>, vector<8x128xf32> -> vector<8x128xf32>
    %c0_17 = arith.constant 0 : index
    %c0_18 = arith.constant 0 : index
    %26 = vector.load %arg7[%c0_17, %c0_18] : memref<1x128xf32, #tpu.memory_space<vmem>>, vector<1x128xf32>
    %27 = vector.broadcast %26 : vector<1x128xf32> to vector<8x128xf32>
    %28 = arith.addf %25, %27 : vector<8x128xf32>
    %29 = tpu.iota {dimensions = array<i32: 1>} : vector<8x128xi32>
    %c51_i32 = arith.constant 51 : i32
    %30 = vector.broadcast %c51_i32 : i32 to vector<8x128xi32>
    %31 = arith.cmpi slt, %29, %30 : vector<8x128xi32>
    %c51_i32_19 = arith.constant 51 : i32
    %32 = vector.broadcast %c51_i32_19 : i32 to vector<8x128xi32>
    %33 = arith.cmpi sge, %29, %32 : vector<8x128xi32>
    %c102_i32 = arith.constant 102 : i32
    %34 = vector.broadcast %c102_i32 : i32 to vector<8x128xi32>
    %35 = arith.cmpi slt, %29, %34 : vector<8x128xi32>
    %36 = arith.andi %33, %35 : vector<8x128xi1>
    %cst_20 = arith.constant -1.000000e+30 : f32
    %37 = vector.broadcast %cst_20 : f32 to vector<8x128xf32>
    %38 = arith.select %31, %28, %37 : vector<8x128xi1>, vector<8x128xf32>
    %cst_21 = arith.constant dense<0xFF800000> : vector<8xf32>
    %39 = vector.multi_reduction <maximumf>, %38, %cst_21 [1] : vector<8x128xf32> to vector<8xf32>
    %40 = vector.shape_cast %39 : vector<8xf32> to vector<8x1xf32>
    %cst_22 = arith.constant -1.000000e+30 : f32
    %41 = vector.broadcast %cst_22 : f32 to vector<8x128xf32>
    %42 = arith.select %36, %28, %41 : vector<8x128xi1>, vector<8x128xf32>
    %cst_23 = arith.constant dense<0xFF800000> : vector<8xf32>
    %43 = vector.multi_reduction <maximumf>, %42, %cst_23 [1] : vector<8x128xf32> to vector<8xf32>
    %44 = vector.shape_cast %43 : vector<8xf32> to vector<8x1xf32>
    %45 = vector.shape_cast %40 : vector<8x1xf32> to vector<8x1xf32>
    %46 = vector.broadcast %45 : vector<8x1xf32> to vector<8x128xf32>
    %47 = vector.shape_cast %44 : vector<8x1xf32> to vector<8x1xf32>
    %48 = vector.broadcast %47 : vector<8x1xf32> to vector<8x128xf32>
    %49 = arith.select %31, %46, %48 : vector<8x128xi1>, vector<8x128xf32>
    %50 = arith.subf %28, %49 : vector<8x128xf32>
    %51 = math.exp %50 : vector<8x128xf32>
    %cst_24 = arith.constant 0.000000e+00 : f32
    %52 = vector.broadcast %cst_24 : f32 to vector<8x128xf32>
    %53 = arith.select %31, %51, %52 : vector<8x128xi1>, vector<8x128xf32>
    %cst_25 = arith.constant dense<0.000000e+00> : vector<8xf32>
    %54 = vector.multi_reduction <add>, %53, %cst_25 [1] : vector<8x128xf32> to vector<8xf32>
    %55 = vector.shape_cast %54 : vector<8xf32> to vector<8x1xf32>
    %cst_26 = arith.constant 0.000000e+00 : f32
    %56 = vector.broadcast %cst_26 : f32 to vector<8x128xf32>
    %57 = arith.select %36, %51, %56 : vector<8x128xi1>, vector<8x128xf32>
    %cst_27 = arith.constant dense<0.000000e+00> : vector<8xf32>
    %58 = vector.multi_reduction <add>, %57, %cst_27 [1] : vector<8x128xf32> to vector<8xf32>
    %59 = vector.shape_cast %58 : vector<8xf32> to vector<8x1xf32>
    %60 = tpu.reciprocal %55 {approx = true} : vector<8x1xf32> -> vector<8x1xf32>
    %61 = tpu.reciprocal %59 {approx = true} : vector<8x1xf32> -> vector<8x1xf32>
    %62 = vector.shape_cast %60 : vector<8x1xf32> to vector<8x1xf32>
    %63 = vector.broadcast %62 : vector<8x1xf32> to vector<8x128xf32>
    %64 = vector.shape_cast %61 : vector<8x1xf32> to vector<8x1xf32>
    %65 = vector.broadcast %64 : vector<8x1xf32> to vector<8x128xf32>
    %66 = arith.select %31, %63, %65 : vector<8x128xi1>, vector<8x128xf32>
    %67 = arith.mulf %51, %66 : vector<8x128xf32>
    %cst_28 = arith.constant 9.99999997E-7 : f32
    %68 = vector.broadcast %cst_28 : f32 to vector<8x128xf32>
    %69 = arith.maximumf %67, %68 : vector<8x128xf32>
    %c0_29 = arith.constant 0 : index
    %c0_30 = arith.constant 0 : index
    %70 = vector.load %arg8[%c0_29, %c0_30] : memref<8x128xf32, #tpu.memory_space<vmem>>, vector<8x128xf32>
    tpu.vector_store %arg8[%c0_29, %c0_30], %69 {strides = array<i32>} : memref<8x128xf32, #tpu.memory_space<vmem>>, vector<8x128xf32>,
    return
  }
  func.func @transform_0(%arg0: i32) -> (i32, i32) {
    %c0_i32 = arith.constant 0 : i32
    %c0_i32_0 = arith.constant 0 : i32
    return %arg0, %c0_i32 : i32, i32
  }
  func.func @transform_1(%arg0: i32) -> (i32, i32) {
    %c0_i32 = arith.constant 0 : i32
    %c0_i32_0 = arith.constant 0 : i32
    %c0_i32_1 = arith.constant 0 : i32
    return %c0_i32, %c0_i32_0 : i32, i32
  }
  func.func @transform_2(%arg0: i32) -> (i32, i32) {
    %c0_i32 = arith.constant 0 : i32
    %c0_i32_0 = arith.constant 0 : i32
    %c0_i32_1 = arith.constant 0 : i32
    return %c0_i32, %c0_i32_0 : i32, i32
  }
  func.func @transform_3(%arg0: i32) -> (i32, i32) {
    %c0_i32 = arith.constant 0 : i32
    %c0_i32_0 = arith.constant 0 : i32
    %c0_i32_1 = arith.constant 0 : i32
    return %c0_i32, %c0_i32_0 : i32, i32
  }
  func.func @transform_4(%arg0: i32) -> (i32, i32) {
    %c0_i32 = arith.constant 0 : i32
    %c0_i32_0 = arith.constant 0 : i32
    %c0_i32_1 = arith.constant 0 : i32
    return %c0_i32, %c0_i32_0 : i32, i32
  }
  func.func @transform_5(%arg0: i32) -> (i32, i32) {
    %c0_i32 = arith.constant 0 : i32
    %c0_i32_0 = arith.constant 0 : i32
    %c0_i32_1 = arith.constant 0 : i32
    return %c0_i32, %c0_i32_0 : i32, i32
  }
  func.func @transform_6(%arg0: i32) -> (i32, i32) {
    %c0_i32 = arith.constant 0 : i32
    %c0_i32_0 = arith.constant 0 : i32
    %c0_i32_1 = arith.constant 0 : i32
    return %c0_i32, %c0_i32_0 : i32, i32
  }
  func.func @transform_7(%arg0: i32) -> (i32, i32) {
    %c0_i32 = arith.constant 0 : i32
    %c0_i32_0 = arith.constant 0 : i32
    return %arg0, %c0_i32 : i32, i32
  }
}

</mosaic_0001>

<bundles_post_ra>
// kernel: tpu_custom_call.1
= control target key start
LH: loop header
LB: loop body
LE: loop exit
PB: predicated region body
PF: predicated region fallthrough
CT: control target
= control target key end

     0   :  { %12 = vsyncpa [#allocation3], 0  ;;  %s585_s0 = inlined_call_operand.hbm [shape: f32[8,16], index: 0, kind: input, shape index: {}]   ;;  %s586_s1 = inlined_call_operand.hbm [shape: bf16[16,32], index: 1, kind: input, shape index: {}]   ;;  %s587_s2 = inlined_call_operand.vmem [shape: f32[1,32], index: 2, kind: input, shape index: {}]   ;;  %s588_s3 = inlined_call_operand.hbm [shape: bf16[32,32], index: 3, kind: input, shape index: {}]   ;;  %s589_s4 = inlined_call_operand.vmem [shape: f32[1,32], index: 4, kind: input, shape index: {}]   ;;  %s590_s5 = inlined_call_operand.hbm [shape: bf16[32,128], index: 5, kind: input, shape index: {}]   ;;  %s591_s6 = inlined_call_operand.vmem [shape: f32[1,128], index: 6, kind: input, shape index: {}]   ;;  %s592_s7 = inlined_call_operand.hbm [shape: f32[8,128], index: 7, kind: output, shape index: {}]  }
   0x1   :  { %13 = vsyncpa [#allocation6], 0 }
   0x2   :  { %14 = vsyncpa [#allocation9], 0 }
   0x3   :  { %15 = vsyncpa [#allocation4], 0  ;;  %s497_s24 = smov [#allocation5]  }
   0x4   :  { %s31_s25 = sshll.u32 %s497_s24, 4  ;;  %s32_s25 = int_to_ptr.vmem [resolvable:$true] %s31_s25 }
   0x5   :  { %s397_s26 = scalar_lea.vmem %s32_s25, 128  ;;  %p402_p1 = scmp.lt.s32.totalorder %s32_s25, %s32_s25 }
   0x6   :  { %p398_p0 = scmp.ne.s32.totalorder %s32_s25, %s397_s26  ;;  %p403_p2 = scmp.lt.s32.totalorder %s397_s26, %s397_s26 }
   0x8   :  { %p404_p3 = por %p403_p2, %p402_p1 }
   0xa   :  { %p405_p4 = pnand %p404_p3, %p398_p0 }
   0xc   :  { %408 = shalt.err (!%p405_p4)
}
   0xd   :  { %s498_s27 = smov 64   ;;  %s499_s28 = smov 4  }
   0xe   :  { %37 = dma.hbm_to_vmem [thread:$0]  %s586_s1, 128, %s32_s25, [#allocation6], %s498_s27, %s498_s27, %s499_s28  }
   0xf   :  { %s500_s8 = smov [#allocation2]   ;;  %s501_s10 = smov [#allocation7]  }
  0x10   :  { %s22_s9 = sshll.u32 %s500_s8, 4  ;;  %s45_s11 = sshll.u32 %s501_s10, 4  ;;  %s23_s9 = int_to_ptr.vmem [resolvable:$true] %s22_s9  ;;  %s46_s11 = int_to_ptr.vmem [resolvable:$true] %s45_s11 }
  0x11   :  { %s417_s12 = scalar_lea.vmem %s23_s9, 128  ;;  %p422_p6 = scmp.lt.s32.totalorder %s23_s9, %s23_s9 }
  0x12   :  { %p418_p5 = scmp.ne.s32.totalorder %s23_s9, %s417_s12  ;;  %p423_p7 = scmp.lt.s32.totalorder %s417_s12, %s417_s12 }
  0x14   :  { %p424_p8 = por %p423_p7, %p422_p6 }
  0x16   :  { %p425_p9 = pnand %p424_p8, %p418_p5 }
  0x18   :  { %428 = shalt.err (!%p425_p9)
}
  0x19   :  { %25 = dma.hbm_to_vmem [thread:$0]  %s585_s0, 128, %s23_s9, [#allocation3]  }
  0x1a   :  { %s437_s15 = scalar_lea.vmem %s46_s11, 256  ;;  %p442_p11 = scmp.lt.s32.totalorder %s46_s11, %s46_s11 }
  0x1b   :  { %p438_p10 = scmp.ne.s32.totalorder %s46_s11, %s437_s15  ;;  %p443_p12 = scmp.lt.s32.totalorder %s437_s15, %s437_s15 }
  0x1d   :  { %p444_p13 = por %p443_p12, %p442_p11 }
  0x1f   :  { %p445_p0 = pnand %p444_p13, %p438_p10 }
  0x21   :  { %448 = shalt.err (!%p445_p0)
}
  0x22   :  { %51 = dma.hbm_to_vmem [thread:$0]  %s588_s3, 256, %s46_s11, [#allocation6], %s498_s27, %s498_s27, %s499_s28  }
  0x23   :  { %s502_s17 = smov [#allocation8]  }
  0x24   :  { %s59_s18 = sshll.u32 %s502_s17, 4  ;;  %s60_s18 = int_to_ptr.vmem [resolvable:$true] %s59_s18 }
  0x25   :  { %s457_s19 = scalar_lea.vmem %s60_s18, 256  ;;  %p462_p2 = scmp.lt.s32.totalorder %s60_s18, %s60_s18 }
  0x26   :  { %p458_p1 = scmp.ne.s32.totalorder %s60_s18, %s457_s19  ;;  %p463_p3 = scmp.lt.s32.totalorder %s457_s19, %s457_s19 }
  0x28   :  { %p464_p4 = por %p463_p3, %p462_p2 }
  0x2a   :  { %p465_p5 = pnand %p464_p4, %p458_p1 }
  0x2c   :  { %468 = shalt.err (!%p465_p5)
}
  0x2d   :  { %65 = dma.hbm_to_vmem [thread:$0]  %s590_s5, 256, %s60_s18, [#allocation9], %s498_s27, %s498_s27, %s499_s28  }
  0x2e   :  { %489 = dma.done.wait [#allocation3], 128  }
  0x2f   :  { %490 = vsyncadd [#allocation3], 4294967168 }
  0x30   :  { %491 = dma.done.wait [#allocation6], 384  }
  0x31   :  { %492 = vsyncadd [#allocation6], 4294966912 }
  0x32   :  { %493 = dma.done.wait [#allocation9], 256  }
  0x33   :  { %494 = vsyncadd [#allocation9], 4294967040  ;;  %v503_v0 = vmov 0.0   ;;  %vm504_vm0 = vmmov 0   ;;  %v378_v1 = vld [vmem:[#allocation5] sm:$0xff]   ;;  %v81_v2 = vld [vmem:[#allocation2] sm:$0xff]  ;;  %v283_v26 = vlaneseq }
  0x34   :  { %347 = vmatprep.subr.bf16.mxu0 %v503_v0  ;;  %349 = vmatprep.mubr.msk.bf16.mxu0 %vm504_vm0, %v503_v0  ;;  %vm98_vm1 = vcmask 130048   ;;  %v82_v3 = vpack.c.bf16 %v81_v2, %v81_v2  ;;  %v379_v4 = vld [vmem:[#allocation7 + $0x8] sm:$0xff]   ;;  %v380_v5 = vld [vmem:[#allocation7] sm:$0xff]   ;;  %v328_v6 = vld [vmem:[%s587_s2] ss:$0 sm:$0xff]  ;;  %vm169_vm3 = vcmask 261120  }
  0x35   :  { %353 = vmatprep.subr.bf16.mxu1 %v503_v0  ;;  %357 = vmatprep.mubr.msk.bf16.mxu1 %vm504_vm0, %v503_v0  ;;  %v381_v15 = vld [vmem:[#allocation8 + $0x8] sm:$0xff]   ;;  %v382_v16 = vld [vmem:[#allocation8] sm:$0xff]   ;;  %v284_v27 = vand.u32 127, %v283_v26 }
  0x36   :  { %348 = vmatpush3.bf16.msra.mxu0 %v378_v1  ;;  %354 = vmatpush3.bf16.msra.mxu1 %v379_v4  ;;  %v331_v17 = vld [vmem:[%s589_s4] ss:$0 sm:$0xff]  ;;  %s505_s4 = smov [#allocation10]  }
  0x37   :  { %361 = vmatprep.subr.bf16.mxu0 %v503_v0  ;;  %355 = vmatprep.subr.bf16.mxu1 %v503_v0  ;;  %v335_v28 = vld [vmem:[%s591_s6] ss:$0 sm:$0xff]  ;;  %vm285_vm5 = vcmp.lt.s32.totalorder %v284_v27, 51  ;;  %vm286_vm6 = vcmp.ge.s32.totalorder %v284_v27, 51  ;;  %vm287_vm7 = vcmp.lt.s32.totalorder %v284_v27, 102  ;;  %s317_s6 = sshll.u32 %s505_s4, 4  ;;  %s318_s6 = int_to_ptr.vmem [resolvable:$true] %s317_s6 }
  0x38   :  { %vm288_vm8 = vmand %vm286_vm6, %vm287_vm7  ;;  %s469_s24 = scalar_lea.vmem %s318_s6, 128  ;;  %p474_p7 = scmp.lt.s32.totalorder %s318_s6, %s318_s6 }
  0x39   :  { %350 = vmatmul.mubr.msk.bf16.vlgmr.msra.gmra.mxu0 %vm98_vm1, %v82_v3  ;;  %p470_p6 = scmp.ne.s32.totalorder %s318_s6, %s469_s24  ;;  %p475_p8 = scmp.lt.s32.totalorder %s469_s24, %s469_s24 }
  0x3a   :  { %365 = vmatprep.mubr.msk.bf16.mxu0 %vm504_vm0, %v503_v0  ;;  %356 = vmatpush3.bf16.msra.mxu1 %v380_v5 }
  0x3b   :  { %362 = vmatpush3.bf16.msra.mxu0 %v381_v15  ;;  %p476_p9 = por %p475_p8, %p474_p7 }
  0x3c   :  { %363 = vmatprep.subr.bf16.mxu0 %v503_v0 }
  0x3d   :  { %p477_p10 = pnand %p476_p9, %p470_p6 }
  0x3f   :  { %364 = vmatpush3.bf16.msra.mxu0 %v382_v16 }
  0xf9   :  { %v136_v7 = vpop.f32.mrf.mxu0 }
  0xfa   :  { %v137_v8 = vadd.f32 %v328_v6, %v136_v7 }
  0xfb   :  { %v351_v9 = vpop.f32.mrf.mxu0 }
  0xfc   :  { %vm142_vm2 = vcmp.gt.f32.partialorder %v137_v8, 0.0  ;;  %v143_v10 = vmul.f32 0.01, %v137_v8 }
  0xfd   :  { %v139_v11 = vpop.f32.mrf.mxu0 }
  0xfe   :  { %v144_v12 = vsel %vm142_vm2, %v137_v8, %v143_v10 }
  0xff   :  { %v145_v13 = vpack.c.bf16 %v144_v12, %v144_v12  ;;  %v352_v14 = vpop.f32.mrf.mxu0 }
 0x101   :  { %358 = vmatmul.mubr.msk.bf16.vlgmr.msra.gmra.mxu1 %vm169_vm3, %v145_v13 }
 0x1c1   :  { %v207_v18 = vpop.f32.mrf.mxu1 }
 0x1c2   :  { %v208_v19 = vadd.f32 %v331_v17, %v207_v18 }
 0x1c3   :  { %v359_v20 = vpop.f32.mrf.mxu1 }
 0x1c4   :  { %vm213_vm4 = vcmp.gt.f32.partialorder %v208_v19, 0.0  ;;  %v214_v21 = vmul.f32 0.01, %v208_v19 }
 0x1c5   :  { %v210_v22 = vpop.f32.mrf.mxu1 }
 0x1c6   :  { %v215_v23 = vsel %vm213_vm4, %v208_v19, %v214_v21 }
 0x1c7   :  { %v216_v24 = vpack.c.bf16 %v215_v23, %v215_v23  ;;  %v360_v25 = vpop.f32.mrf.mxu1 }
 0x1c9   :  { %366 = vmatmul.mubr.msk.bf16.vlgmr.msra.gmra.mxu0 %vm169_vm3, %v216_v24 }
 0x289   :  { %v277_v29 = vpop.f32.mrf.mxu0 }
 0x28a   :  { %v278_v30 = vadd.f32 %v335_v28, %v277_v29 }
 0x28b   :  { %v367_v31 = vpop.f32.mrf.mxu0 }
 0x28c   :  { %v289_v32 = vsel %vm285_vm5, %v278_v30, -1e+30  ;;  %v292_v35 = vsel %vm288_vm8, %v278_v30, -1e+30 }
 0x28d   :  { %290 = vmax.xlane.f32.xlu0 %v289_v32  ;;  %v280_v33 = vpop.f32.mrf.mxu0 }
 0x28f   :  { %v368_v34 = vpop.f32.mrf.mxu0 }
 0x291   :  { %293 = vmax.xlane.f32.xlu0 %v292_v35 }
 0x316   :  { %v291_v36 = vpop.xlane.xlu0 %290 }
 0x31a   :  { %v294_v37 = vpop.xlane.xlu0 %293 }
 0x31b   :  { %v295_v38 = vsel %vm285_vm5, %v291_v36, %v294_v37 }
 0x31c   :  { %v296_v39 = vsub.f32 %v278_v30, %v295_v38 }
 0x31e   :  { %v297_v40 = vmul.f32 1.442695, %v296_v39 }
 0x320   :  { %383 = vpow2.f32 %v297_v40 }
 0x32d   :  { %v384_v41 = vpop.eup %383 }
 0x32e   :  { %v299_v42 = vsel %vm285_vm5, %v384_v41, 0.0  ;;  %v302_v43 = vsel %vm288_vm8, %v384_v41, 0.0 }
 0x32f   :  { %300 = vadd.xlane.f32.xlu1 %v299_v42 }
 0x333   :  { %303 = vadd.xlane.f32.xlu1 %v302_v43 }
 0x3b8   :  { %v301_v44 = vpop.xlane.xlu1 %300 }
 0x3b9   :  { %385 = vrcp.f32 %v301_v44 }
 0x3bc   :  { %v304_v45 = vpop.xlane.xlu1 %303 }
 0x3bd   :  { %387 = vrcp.f32 %v304_v45 }
 0x3c6   :  { %v386_v46 = vpop.eup %385 }
 0x3ca   :  { %v388_v47 = vpop.eup %387 }
 0x3cb   :  { %v307_v48 = vsel %vm285_vm5, %v386_v46, %v388_v47 }
 0x3cc   :  { %v308_v49 = vmul.f32 %v384_v41, %v307_v48 }
 0x3ce   :  { %v309_v50 = vmax.f32 %v308_v49, 1e-06 }
 0x3d0   :  { %310 = vst [vmem:[#allocation10] sm:$0xff] %v309_v50 }
 0x3d1   :  { %480 = shalt.err (!%p477_p10)
}
 0x3d2   :  { %320 = dma.vmem_to_hbm [thread:$0]  %s318_s6, 128, %s592_s7, [#allocation4]  }
 0x3d3   :  { %495 = dma.done.wait [#allocation4], 128  }
 0x3d4   :  { %496 = vsyncadd [#allocation4], 4294967168 }
 0x3d5   :  { %324 = vsyncpa [#allocation3], 1 }
 0x3d6   :  { %325 = vsyncpa [#allocation6], 1 }
 0x3d7   :  { %326 = vsyncpa [#allocation9], 1 }
 0x3d8   :  { %327 = vsyncpa [#allocation4], 1 }

</bundles_post_ra>
